<compile_context>
chip_gen: v6e
topology: v6e:2x2x1
jax: 0.10.0
libtpu: 0.0.40
codegen_flags: <defaults>
</compile_context>

<pallas_src>
import jax
import jax.numpy as jnp
from jax.experimental import pallas as pl
from jax.experimental.pallas import tpu as pltpu


def _graph_cls_kernel(
    x_ref,       # (1, G, FR, NF)  pooled tokens for G graphs
    bigw_ref,    # (L+2, NF, NF)   [Wq, Wk, gcn_0, ..., gcn_{L-1}]
    vec_ref,     # (2+2L, NF)      [bq, bk, gamma_0, beta_0, gamma_1, beta_1, ...]
    fc1w_ref,    # (NF, H)
    fc1b_ref,    # (1, H)
    fc2w_ref,    # (H, CPAD)
    fc2b_ref,    # (1, CPAD)
    out_ref,     # (1, G, CPAD)
):
    _, G, FR, NF = x_ref.shape
    L = bigw_ref.shape[0] - 2

    x = x_ref[0]                                   # (G, FR, NF)
    x2 = x.reshape(G * FR, NF)                     # flatten graphs -> large-M matmuls

    # --- GraphModule: attention-style adjacency ---
    qx = (jnp.dot(x2, bigw_ref[0], preferred_element_type=jnp.float32)
          + vec_ref[0]).reshape(G, FR, NF)
    kx = (jnp.dot(x2, bigw_ref[1], preferred_element_type=jnp.float32)
          + vec_ref[1]).reshape(G, FR, NF)
    dot_mat = jnp.einsum("gid,gjd->gij", qx, kx,
                         preferred_element_type=jnp.float32)   # (G, FR, FR)
    sq = dot_mat * dot_mat
    # F.normalize(., p=1, dim=-1): divide by max(sum(|.|), 1e-12); sq >= 0.
    denom = jnp.maximum(jnp.sum(sq, axis=-1, keepdims=True), 1e-12)
    # approx reciprocal on the EUP; the per-row scale error cancels through LayerNorm.
    adj = sq * pl.reciprocal(denom, approx=True)                # (G, FR, FR)

    # --- GCN layers: x = relu(LayerNorm(adj @ (x @ W))) ---
    inv_nf = 1.0 / NF
    for l in range(L):  # static Python loop, small L
        h = jnp.dot(x.reshape(G * FR, NF), bigw_ref[2 + l],
                    preferred_element_type=jnp.float32).reshape(G, FR, NF)
        h = jnp.einsum("gij,gjk->gik", adj, h,
                       preferred_element_type=jnp.float32)      # (G, FR, NF)
        mu = jnp.sum(h, axis=-1, keepdims=True) * inv_nf
        d = h - mu
        var = jnp.sum(d * d, axis=-1, keepdims=True) * inv_nf   # biased var (PyTorch LN)
        h = d * jax.lax.rsqrt(var + 1e-5)
        h = h * vec_ref[2 + 2 * l] + vec_ref[3 + 2 * l]
        x = jnp.maximum(h, 0.0)

    # mean over tokens (dim=-2)
    pooled = jnp.sum(x, axis=1) * (1.0 / FR)                    # (G, NF)

    # --- ClassifierSimple (Dropout is identity at inference) ---
    h1 = jnp.dot(pooled, fc1w_ref[...],
                 preferred_element_type=jnp.float32) + fc1b_ref[...]
    h1 = jnp.maximum(h1, 0.0)
    logits = jnp.dot(h1, fc2w_ref[...],
                     preferred_element_type=jnp.float32) + fc2b_ref[...]
    out_ref[0] = logits                                         # (G, CPAD) lane-dense


def _choose_graph_block(n, fr, nf, g_max=256, budget_bytes=3 * 1024 * 1024):
    """Graphs per grid step.

    Large enough to amortize the ~0.35us per-grid-step pipeline overhead,
    small enough that the double-buffered input block plus the per-step
    intermediates (q, k, h, adj) stay comfortably inside the default scoped
    VMEM limit on every chip (16 MiB on v5e, 32 MiB on v6e/v7x).
    """
    lane = 128
    nf_pad = -(-nf // lane) * lane
    fr_pad = -(-fr // 8) * 8
    per_graph = 4 * (
        2 * fr_pad * nf_pad          # double-buffered x input block
        + 4 * fr_pad * nf_pad        # qx, kx, h, relu/LN temporaries
        + fr_pad * max(fr, lane)     # adjacency (lane-padded)
    )
    g = max(1, min(g_max, budget_bytes // max(per_graph, 1), n))
    # keep >= 2 grid steps when possible so both v7x TensorCores get work
    if n >= 2 and -(-n // g) < 2:
        g = -(-n // 2)
    return g


def mean_and_token_graph_forward(feats, params, g_block=None):
    """feats: (N, FR, B, NF) float32 -> logits (N, C)."""
    N, FR, B, NF = feats.shape
    L = params["gcn_w"].shape[0]
    H = params["fc1_w"].shape[1]
    C = params["fc2_w"].shape[1]
    CPAD = ((C + 127) // 128) * 128

    # Token (bag) pooling done by XLA: kernel only sees (N, FR, NF).
    x = jnp.mean(feats, axis=2)                                  # (N, FR, NF)

    G = g_block if g_block is not None else _choose_graph_block(N, FR, NF)
    NB = pl.cdiv(N, G)
    NPAD = NB * G
    if NPAD != N:
        x = jnp.pad(x, ((0, NPAD - N), (0, 0), (0, 0)))
    xb = x.reshape(NB, G, FR, NF)

    # Consolidate the small parameters into a few stacked arrays.
    big_w = jnp.concatenate(
        [params["wq_w"][None], params["wk_w"][None], params["gcn_w"]], axis=0
    )                                                            # (L+2, NF, NF)
    vecs = jnp.concatenate(
        [
            params["wq_b"].reshape(1, NF),
            params["wk_b"].reshape(1, NF),
            jnp.stack([params["ln_gamma"], params["ln_beta"]], axis=1).reshape(2 * L, NF),
        ],
        axis=0,
    )                                                            # (2+2L, NF)
    fc1_b = params["fc1_b"].reshape(1, H)
    fc2_w = jnp.pad(params["fc2_w"], ((0, 0), (0, CPAD - C)))    # (H, CPAD)
    fc2_b = jnp.pad(params["fc2_b"].reshape(1, C), ((0, 0), (0, CPAD - C)))

    full = lambda shape: pl.BlockSpec(shape, lambda n: tuple(0 for _ in shape))

    out = pl.pallas_call(
        _graph_cls_kernel,
        out_shape=jax.ShapeDtypeStruct((NB, G, CPAD), jnp.float32),
        grid_spec=pltpu.PrefetchScalarGridSpec(
            num_scalar_prefetch=0,
            grid=(NB,),
            in_specs=[
                pl.BlockSpec((1, G, FR, NF), lambda n: (n, 0, 0, 0)),
                full((L + 2, NF, NF)),
                full((2 + 2 * L, NF)),
                full((NF, H)), full((1, H)),
                full((H, CPAD)), full((1, CPAD)),
            ],
            out_specs=pl.BlockSpec((1, G, CPAD), lambda n: (n, 0, 0)),
        ),
        compiler_params=pltpu.CompilerParams(
            dimension_semantics=("parallel",),
        ),
    )(xb, big_w, vecs, params["fc1_w"], fc1_b, fc2_w, fc2_b)

    return out.reshape(NPAD, CPAD)[:N, :C]


def make_params(key, num_feats, num_hid, num_class, gcn_layers):
    ks = jax.random.split(key, 8)

    def xavier(k, shape):
        fan_in, fan_out = shape[-2], shape[-1]
        limit = (6.0 / (fan_in + fan_out)) ** 0.5
        return jax.random.uniform(k, shape, jnp.float32, -limit, limit)

    return {
        "wq_w": xavier(ks[0], (num_feats, num_feats)),
        "wq_b": jax.random.uniform(ks[1], (1, num_feats), jnp.float32, -0.1, 0.1),
        "wk_w": xavier(ks[2], (num_feats, num_feats)),
        "wk_b": jax.random.uniform(ks[3], (1, num_feats), jnp.float32, -0.1, 0.1),
        "gcn_w": xavier(ks[4], (gcn_layers, num_feats, num_feats)),
        "ln_gamma": jnp.ones((gcn_layers, num_feats), jnp.float32),
        "ln_beta": jnp.zeros((gcn_layers, num_feats), jnp.float32),
        "fc1_w": xavier(ks[5], (num_feats, num_hid)),
        "fc1_b": jax.random.uniform(ks[6], (1, num_hid), jnp.float32, -0.1, 0.1),
        "fc2_w": xavier(ks[7], (num_hid, num_class)),
        "fc2_b": jnp.zeros((1, num_class), jnp.float32),
    }


def reference_forward(feats, params):
    """Pure-JAX reference mirroring the PyTorch forward (eval mode)."""
    N, FR, B, NF = feats.shape
    x = feats.mean(axis=2)                                       # (N, FR, NF)
    qx = x @ params["wq_w"] + params["wq_b"].reshape(-1)
    kx = x @ params["wk_w"] + params["wk_b"].reshape(-1)
    dot = jnp.einsum("nij,nkj->nik", qx, kx)
    sq = dot * dot
    adj = sq / jnp.maximum(jnp.sum(sq, axis=-1, keepdims=True), 1e-12)
    for l in range(params["gcn_w"].shape[0]):
        h = jnp.einsum("nij,njk->nik", adj, x @ params["gcn_w"][l])
        mu = h.mean(-1, keepdims=True)
        var = ((h - mu) ** 2).mean(-1, keepdims=True)
        h = (h - mu) / jnp.sqrt(var + 1e-5)
        h = h * params["ln_gamma"][l] + params["ln_beta"][l]
        x = jnp.maximum(h, 0.0)
    pooled = x.mean(axis=-2)
    h1 = jnp.maximum(pooled @ params["fc1_w"] + params["fc1_b"].reshape(-1), 0.0)
    return h1 @ params["fc2_w"] + params["fc2_b"].reshape(-1)


if __name__ == "__main__":
    N, FR, B, NF = 2, 8, 4, 32
    num_hid = NF // 2
    num_class = 5
    gcn_layers = 2

    key = jax.random.PRNGKey(0)
    k_feats, k_params = jax.random.split(key)
    feats = jax.random.normal(k_feats, (N, FR, B, NF), jnp.float32)
    params = make_params(k_params, NF, num_hid, num_class, gcn_layers)

    out = jax.jit(mean_and_token_graph_forward)(feats, params)
    out = jax.block_until_ready(out)

    ref = reference_forward(feats, params)
    assert out.shape == (N, num_class)
    assert jnp.all(jnp.isfinite(out))
    assert jnp.allclose(out, ref, atol=2e-4, rtol=2e-4)
    print("KERNEL_OK")
</pallas_src>

<mosaic_0001>
module attributes {stable_mosaic.version = 11 : i64} {
  func.func @_graph_cls_kernel(%arg0: i32, %arg1: memref<1x1x8x32xf32, #tpu.memory_space<vmem>>, %arg2: memref<4x32x32xf32, #tpu.memory_space<vmem>>, %arg3: memref<6x32xf32, #tpu.memory_space<vmem>>, %arg4: memref<32x16xf32, #tpu.memory_space<vmem>>, %arg5: memref<1x16xf32, #tpu.memory_space<vmem>>, %arg6: memref<16x128xf32, #tpu.memory_space<vmem>>, %arg7: memref<1x128xf32, #tpu.memory_space<vmem>>, %arg8: memref<1x1x128xf32, #tpu.memory_space<vmem>>) attributes {dimension_semantics = [#tpu.dimension_semantics<parallel>], iteration_bounds = array<i64: 2>, scalar_prefetch = 0 : i64, scratch_operands = 0 : i64, tpu.core_type = #tpu.core_type<tc>, window_params = [{transform_indices = @transform_0, window_bounds = array<i64: 1, 1, 8, 32>}, {pipeline_mode = #tpu.pipeline_mode<synchronous>, transform_indices = @transform_1, window_bounds = array<i64: 4, 32, 32>}, {pipeline_mode = #tpu.pipeline_mode<synchronous>, transform_indices = @transform_2, window_bounds = array<i64: 6, 32>}, {pipeline_mode = #tpu.pipeline_mode<synchronous>, transform_indices = @transform_3, window_bounds = array<i64: 32, 16>}, {pipeline_mode = #tpu.pipeline_mode<synchronous>, transform_indices = @transform_4, window_bounds = array<i64: 1, 16>}, {pipeline_mode = #tpu.pipeline_mode<synchronous>, transform_indices = @transform_5, window_bounds = array<i64: 16, 128>}, {pipeline_mode = #tpu.pipeline_mode<synchronous>, transform_indices = @transform_6, window_bounds = array<i64: 1, 128>}, {transform_indices = @transform_7, window_bounds = array<i64: 1, 1, 128>}]} {
    %c0 = arith.constant 0 : index
    %c0_0 = arith.constant 0 : index
    %c0_1 = arith.constant 0 : index
    %c0_2 = arith.constant 0 : index
    %0 = vector.load %arg1[%c0, %c0_0, %c0_1, %c0_2] : memref<1x1x8x32xf32, #tpu.memory_space<vmem>>, vector<1x1x8x32xf32>
    %1 = vector.shape_cast %0 : vector<1x1x8x32xf32> to vector<1x8x32xf32>
    %2 = vector.shape_cast %1 : vector<1x8x32xf32> to vector<8x32xf32>
    %c0_3 = arith.constant 0 : index
    %c0_4 = arith.constant 0 : index
    %c0_5 = arith.constant 0 : index
    %3 = vector.load %arg2[%c0_3, %c0_4, %c0_5] : memref<4x32x32xf32, #tpu.memory_space<vmem>>, vector<1x32x32xf32>
    %4 = vector.shape_cast %3 : vector<1x32x32xf32> to vector<32x32xf32>
    %cst = arith.constant dense<0.000000e+00> : vector<8x32xf32>
    %5 = tpu.matmul %2, %4, %cst {dimension_numbers = #tpu.dot_dimension_numbers<[1], [0], [0], [1], [0, 0, 1, 1], [], []>} : vector<8x32xf32>, vector<32x32xf32>, vector<8x32xf32> -> vector<8x32xf32>
    %c0_6 = arith.constant 0 : index
    %c0_7 = arith.constant 0 : index
    %6 = vector.load %arg3[%c0_6, %c0_7] : memref<6x32xf32, #tpu.memory_space<vmem>>, vector<1x32xf32>
    %7 = vector.shape_cast %6 : vector<1x32xf32> to vector<32xf32>
    %8 = vector.shape_cast %7 : vector<32xf32> to vector<1x32xf32>
    %9 = vector.broadcast %8 : vector<1x32xf32> to vector<8x32xf32>
    %10 = arith.addf %5, %9 : vector<8x32xf32>
    %11 = vector.shape_cast %10 : vector<8x32xf32> to vector<1x8x32xf32>
    %c1 = arith.constant 1 : index
    %c0_8 = arith.constant 0 : index
    %c0_9 = arith.constant 0 : index
    %12 = vector.load %arg2[%c1, %c0_8, %c0_9] : memref<4x32x32xf32, #tpu.memory_space<vmem>>, vector<1x32x32xf32>
    %13 = vector.shape_cast %12 : vector<1x32x32xf32> to vector<32x32xf32>
    %cst_10 = arith.constant dense<0.000000e+00> : vector<8x32xf32>
    %14 = tpu.matmul %2, %13, %cst_10 {dimension_numbers = #tpu.dot_dimension_numbers<[1], [0], [0], [1], [0, 0, 1, 1], [], []>} : vector<8x32xf32>, vector<32x32xf32>, vector<8x32xf32> -> vector<8x32xf32>
    %c1_11 = arith.constant 1 : index
    %c0_12 = arith.constant 0 : index
    %15 = vector.load %arg3[%c1_11, %c0_12] : memref<6x32xf32, #tpu.memory_space<vmem>>, vector<1x32xf32>
    %16 = vector.shape_cast %15 : vector<1x32xf32> to vector<32xf32>
    %17 = vector.shape_cast %16 : vector<32xf32> to vector<1x32xf32>
    %18 = vector.broadcast %17 : vector<1x32xf32> to vector<8x32xf32>
    %19 = arith.addf %14, %18 : vector<8x32xf32>
    %20 = vector.shape_cast %19 : vector<8x32xf32> to vector<1x8x32xf32>
    "tpu.trace_start"() <{level = 10 : i32, message = "gid,gjd->gij"}> : () -> ()
    %cst_13 = arith.constant dense<0.000000e+00> : vector<1x8x8xf32>
    %21 = tpu.matmul %11, %20, %cst_13 {dimension_numbers = #tpu.dot_dimension_numbers<[2], [2], [1], [1], [0, 0, 0, 1, 1, 1], [0], [0]>} : vector<1x8x32xf32>, vector<1x8x32xf32>, vector<1x8x8xf32> -> vector<1x8x8xf32>
    "tpu.trace_stop"() : () -> ()
    %22 = arith.mulf %21, %21 : vector<1x8x8xf32>
    %cst_14 = arith.constant dense<0.000000e+00> : vector<1x8xf32>
    %23 = vector.multi_reduction <add>, %22, %cst_14 [2] : vector<1x8x8xf32> to vector<1x8xf32>
    %24 = vector.shape_cast %23 : vector<1x8xf32> to vector<1x8x1xf32>
    %cst_15 = arith.constant 9.99999996E-13 : f32
    %25 = vector.broadcast %cst_15 : f32 to vector<1x8x1xf32>
    %26 = arith.maximumf %24, %25 : vector<1x8x1xf32>
    %27 = tpu.reciprocal %26 {approx = true} : vector<1x8x1xf32> -> vector<1x8x1xf32>
    %28 = vector.broadcast %27 : vector<1x8x1xf32> to vector<1x8x8xf32>
    %29 = arith.mulf %22, %28 : vector<1x8x8xf32>
    %30 = vector.shape_cast %1 : vector<1x8x32xf32> to vector<8x32xf32>
    %c2 = arith.constant 2 : index
    %c0_16 = arith.constant 0 : index
    %c0_17 = arith.constant 0 : index
    %31 = vector.load %arg2[%c2, %c0_16, %c0_17] : memref<4x32x32xf32, #tpu.memory_space<vmem>>, vector<1x32x32xf32>
    %32 = vector.shape_cast %31 : vector<1x32x32xf32> to vector<32x32xf32>
    %cst_18 = arith.constant dense<0.000000e+00> : vector<8x32xf32>
    %33 = tpu.matmul %30, %32, %cst_18 {dimension_numbers = #tpu.dot_dimension_numbers<[1], [0], [0], [1], [0, 0, 1, 1], [], []>} : vector<8x32xf32>, vector<32x32xf32>, vector<8x32xf32> -> vector<8x32xf32>
    %34 = vector.shape_cast %33 : vector<8x32xf32> to vector<1x8x32xf32>
    "tpu.trace_start"() <{level = 10 : i32, message = "gij,gjk->gik"}> : () -> ()
    %cst_19 = arith.constant dense<0.000000e+00> : vector<1x8x32xf32>
    %35 = tpu.matmul %29, %34, %cst_19 {dimension_numbers = #tpu.dot_dimension_numbers<[2], [1], [1], [2], [0, 0, 0, 1, 1, 2], [0], [0]>} : vector<1x8x8xf32>, vector<1x8x32xf32>, vector<1x8x32xf32> -> vector<1x8x32xf32>
    "tpu.trace_stop"() : () -> ()
    %cst_20 = arith.constant dense<0.000000e+00> : vector<1x8xf32>
    %36 = vector.multi_reduction <add>, %35, %cst_20 [2] : vector<1x8x32xf32> to vector<1x8xf32>
    %37 = vector.shape_cast %36 : vector<1x8xf32> to vector<1x8x1xf32>
    %cst_21 = arith.constant 3.125000e-02 : f32
    %38 = vector.broadcast %cst_21 : f32 to vector<1x8x1xf32>
    %39 = arith.mulf %37, %38 : vector<1x8x1xf32>
    %40 = vector.broadcast %39 : vector<1x8x1xf32> to vector<1x8x32xf32>
    %41 = arith.subf %35, %40 : vector<1x8x32xf32>
    %42 = arith.mulf %41, %41 : vector<1x8x32xf32>
    %cst_22 = arith.constant dense<0.000000e+00> : vector<1x8xf32>
    %43 = vector.multi_reduction <add>, %42, %cst_22 [2] : vector<1x8x32xf32> to vector<1x8xf32>
    %44 = vector.shape_cast %43 : vector<1x8xf32> to vector<1x8x1xf32>
    %cst_23 = arith.constant 3.125000e-02 : f32
    %45 = vector.broadcast %cst_23 : f32 to vector<1x8x1xf32>
    %46 = arith.mulf %44, %45 : vector<1x8x1xf32>
    %cst_24 = arith.constant 9.99999974E-6 : f32
    %47 = vector.broadcast %cst_24 : f32 to vector<1x8x1xf32>
    %48 = arith.addf %46, %47 : vector<1x8x1xf32>
    %49 = math.rsqrt %48 : vector<1x8x1xf32>
    %50 = vector.broadcast %49 : vector<1x8x1xf32> to vector<1x8x32xf32>
    %51 = arith.mulf %41, %50 : vector<1x8x32xf32>
    %c2_25 = arith.constant 2 : index
    %c0_26 = arith.constant 0 : index
    %52 = vector.load %arg3[%c2_25, %c0_26] : memref<6x32xf32, #tpu.memory_space<vmem>>, vector<1x32xf32>
    %53 = vector.shape_cast %52 : vector<1x32xf32> to vector<32xf32>
    %54 = vector.shape_cast %53 : vector<32xf32> to vector<1x1x32xf32>
    %55 = vector.broadcast %54 : vector<1x1x32xf32> to vector<1x8x32xf32>
    %56 = arith.mulf %51, %55 : vector<1x8x32xf32>
    %c3 = arith.constant 3 : index
    %c0_27 = arith.constant 0 : index
    %57 = vector.load %arg3[%c3, %c0_27] : memref<6x32xf32, #tpu.memory_space<vmem>>, vector<1x32xf32>
    %58 = vector.shape_cast %57 : vector<1x32xf32> to vector<32xf32>
    %59 = vector.shape_cast %58 : vector<32xf32> to vector<1x1x32xf32>
    %60 = vector.broadcast %59 : vector<1x1x32xf32> to vector<1x8x32xf32>
    %61 = arith.addf %56, %60 : vector<1x8x32xf32>
    %cst_28 = arith.constant 0.000000e+00 : f32
    %62 = vector.broadcast %cst_28 : f32 to vector<1x8x32xf32>
    %63 = arith.maximumf %61, %62 : vector<1x8x32xf32>
    %64 = vector.shape_cast %63 : vector<1x8x32xf32> to vector<8x32xf32>
    %c3_29 = arith.constant 3 : index
    %c0_30 = arith.constant 0 : index
    %c0_31 = arith.constant 0 : index
    %65 = vector.load %arg2[%c3_29, %c0_30, %c0_31] : memref<4x32x32xf32, #tpu.memory_space<vmem>>, vector<1x32x32xf32>
    %66 = vector.shape_cast %65 : vector<1x32x32xf32> to vector<32x32xf32>
    %cst_32 = arith.constant dense<0.000000e+00> : vector<8x32xf32>
    %67 = tpu.matmul %64, %66, %cst_32 {dimension_numbers = #tpu.dot_dimension_numbers<[1], [0], [0], [1], [0, 0, 1, 1], [], []>} : vector<8x32xf32>, vector<32x32xf32>, vector<8x32xf32> -> vector<8x32xf32>
    %68 = vector.shape_cast %67 : vector<8x32xf32> to vector<1x8x32xf32>
    "tpu.trace_start"() <{level = 10 : i32, message = "gij,gjk->gik"}> : () -> ()
    %cst_33 = arith.constant dense<0.000000e+00> : vector<1x8x32xf32>
    %69 = tpu.matmul %29, %68, %cst_33 {dimension_numbers = #tpu.dot_dimension_numbers<[2], [1], [1], [2], [0, 0, 0, 1, 1, 2], [0], [0]>} : vector<1x8x8xf32>, vector<1x8x32xf32>, vector<1x8x32xf32> -> vector<1x8x32xf32>
    "tpu.trace_stop"() : () -> ()
    %cst_34 = arith.constant dense<0.000000e+00> : vector<1x8xf32>
    %70 = vector.multi_reduction <add>, %69, %cst_34 [2] : vector<1x8x32xf32> to vector<1x8xf32>
    %71 = vector.shape_cast %70 : vector<1x8xf32> to vector<1x8x1xf32>
    %cst_35 = arith.constant 3.125000e-02 : f32
    %72 = vector.broadcast %cst_35 : f32 to vector<1x8x1xf32>
    %73 = arith.mulf %71, %72 : vector<1x8x1xf32>
    %74 = vector.broadcast %73 : vector<1x8x1xf32> to vector<1x8x32xf32>
    %75 = arith.subf %69, %74 : vector<1x8x32xf32>
    %76 = arith.mulf %75, %75 : vector<1x8x32xf32>
    %cst_36 = arith.constant dense<0.000000e+00> : vector<1x8xf32>
    %77 = vector.multi_reduction <add>, %76, %cst_36 [2] : vector<1x8x32xf32> to vector<1x8xf32>
    %78 = vector.shape_cast %77 : vector<1x8xf32> to vector<1x8x1xf32>
    %cst_37 = arith.constant 3.125000e-02 : f32
    %79 = vector.broadcast %cst_37 : f32 to vector<1x8x1xf32>
    %80 = arith.mulf %78, %79 : vector<1x8x1xf32>
    %cst_38 = arith.constant 9.99999974E-6 : f32
    %81 = vector.broadcast %cst_38 : f32 to vector<1x8x1xf32>
    %82 = arith.addf %80, %81 : vector<1x8x1xf32>
    %83 = math.rsqrt %82 : vector<1x8x1xf32>
    %84 = vector.broadcast %83 : vector<1x8x1xf32> to vector<1x8x32xf32>
    %85 = arith.mulf %75, %84 : vector<1x8x32xf32>
    %c4 = arith.constant 4 : index
    %c0_39 = arith.constant 0 : index
    %86 = vector.load %arg3[%c4, %c0_39] : memref<6x32xf32, #tpu.memory_space<vmem>>, vector<1x32xf32>
    %87 = vector.shape_cast %86 : vector<1x32xf32> to vector<32xf32>
    %88 = vector.shape_cast %87 : vector<32xf32> to vector<1x1x32xf32>
    %89 = vector.broadcast %88 : vector<1x1x32xf32> to vector<1x8x32xf32>
    %90 = arith.mulf %85, %89 : vector<1x8x32xf32>
    %c5 = arith.constant 5 : index
    %c0_40 = arith.constant 0 : index
    %91 = vector.load %arg3[%c5, %c0_40] : memref<6x32xf32, #tpu.memory_space<vmem>>, vector<1x32xf32>
    %92 = vector.shape_cast %91 : vector<1x32xf32> to vector<32xf32>
    %93 = vector.shape_cast %92 : vector<32xf32> to vector<1x1x32xf32>
    %94 = vector.broadcast %93 : vector<1x1x32xf32> to vector<1x8x32xf32>
    %95 = arith.addf %90, %94 : vector<1x8x32xf32>
    %cst_41 = arith.constant 0.000000e+00 : f32
    %96 = vector.broadcast %cst_41 : f32 to vector<1x8x32xf32>
    %97 = arith.maximumf %95, %96 : vector<1x8x32xf32>
    %cst_42 = arith.constant dense<0.000000e+00> : vector<1x32xf32>
    %98 = vector.multi_reduction <add>, %97, %cst_42 [1] : vector<1x8x32xf32> to vector<1x32xf32>
    %cst_43 = arith.constant 1.250000e-01 : f32
    %99 = vector.broadcast %cst_43 : f32 to vector<1x32xf32>
    %100 = arith.mulf %98, %99 : vector<1x32xf32>
    %c0_44 = arith.constant 0 : index
    %c0_45 = arith.constant 0 : index
    %101 = vector.load %arg4[%c0_44, %c0_45] : memref<32x16xf32, #tpu.memory_space<vmem>>, vector<32x16xf32>
    %cst_46 = arith.constant dense<0.000000e+00> : vector<1x16xf32>
    %102 = tpu.matmul %100, %101, %cst_46 {dimension_numbers = #tpu.dot_dimension_numbers<[1], [0], [0], [1], [0, 0, 1, 1], [], []>} : vector<1x32xf32>, vector<32x16xf32>, vector<1x16xf32> -> vector<1x16xf32>
    %c0_47 = arith.constant 0 : index
    %c0_48 = arith.constant 0 : index
    %103 = vector.load %arg5[%c0_47, %c0_48] : memref<1x16xf32, #tpu.memory_space<vmem>>, vector<1x16xf32>
    %104 = arith.addf %102, %103 : vector<1x16xf32>
    %cst_49 = arith.constant 0.000000e+00 : f32
    %105 = vector.broadcast %cst_49 : f32 to vector<1x16xf32>
    %106 = arith.maximumf %104, %105 : vector<1x16xf32>
    %c0_50 = arith.constant 0 : index
    %c0_51 = arith.constant 0 : index
    %107 = vector.load %arg6[%c0_50, %c0_51] : memref<16x128xf32, #tpu.memory_space<vmem>>, vector<16x128xf32>
    %cst_52 = arith.constant dense<0.000000e+00> : vector<1x128xf32>
    %108 = tpu.matmul %106, %107, %cst_52 {dimension_numbers = #tpu.dot_dimension_numbers<[1], [0], [0], [1], [0, 0, 1, 1], [], []>} : vector<1x16xf32>, vector<16x128xf32>, vector<1x128xf32> -> vector<1x128xf32>
    %c0_53 = arith.constant 0 : index
    %c0_54 = arith.constant 0 : index
    %109 = vector.load %arg7[%c0_53, %c0_54] : memref<1x128xf32, #tpu.memory_space<vmem>>, vector<1x128xf32>
    %110 = arith.addf %108, %109 : vector<1x128xf32>
    %c0_55 = arith.constant 0 : index
    %c0_56 = arith.constant 0 : index
    %c0_57 = arith.constant 0 : index
    %111 = vector.load %arg8[%c0_55, %c0_56, %c0_57] : memref<1x1x128xf32, #tpu.memory_space<vmem>>, vector<1x1x128xf32>
    %112 = vector.shape_cast %111 : vector<1x1x128xf32> to vector<1x128xf32>
    %113 = vector.shape_cast %110 : vector<1x128xf32> to vector<1x1x128xf32>
    tpu.vector_store %arg8[%c0_55, %c0_56, %c0_57], %113 {strides = array<i32>} : memref<1x1x128xf32, #tpu.memory_space<vmem>>, vector<1x1x128xf32>,
    return
  }
  func.func @transform_0(%arg0: i32) -> (i32, i32, i32, i32) {
    %c0_i32 = arith.constant 0 : i32
    %c0_i32_0 = arith.constant 0 : i32
    %c0_i32_1 = arith.constant 0 : i32
    %c0_i32_2 = arith.constant 0 : i32
    return %arg0, %c0_i32, %c0_i32_0, %c0_i32_1 : i32, i32, i32, i32
  }
  func.func @transform_1(%arg0: i32) -> (i32, i32, i32) {
    %c0_i32 = arith.constant 0 : i32
    %c0_i32_0 = arith.constant 0 : i32
    %c0_i32_1 = arith.constant 0 : i32
    %c0_i32_2 = arith.constant 0 : i32
    return %c0_i32, %c0_i32_0, %c0_i32_1 : i32, i32, i32
  }
  func.func @transform_2(%arg0: i32) -> (i32, i32) {
    %c0_i32 = arith.constant 0 : i32
    %c0_i32_0 = arith.constant 0 : i32
    %c0_i32_1 = arith.constant 0 : i32
    return %c0_i32, %c0_i32_0 : i32, i32
  }
  func.func @transform_3(%arg0: i32) -> (i32, i32) {
    %c0_i32 = arith.constant 0 : i32
    %c0_i32_0 = arith.constant 0 : i32
    %c0_i32_1 = arith.constant 0 : i32
    return %c0_i32, %c0_i32_0 : i32, i32
  }
  func.func @transform_4(%arg0: i32) -> (i32, i32) {
    %c0_i32 = arith.constant 0 : i32
    %c0_i32_0 = arith.constant 0 : i32
    %c0_i32_1 = arith.constant 0 : i32
    return %c0_i32, %c0_i32_0 : i32, i32
  }
  func.func @transform_5(%arg0: i32) -> (i32, i32) {
    %c0_i32 = arith.constant 0 : i32
    %c0_i32_0 = arith.constant 0 : i32
    %c0_i32_1 = arith.constant 0 : i32
    return %c0_i32, %c0_i32_0 : i32, i32
  }
  func.func @transform_6(%arg0: i32) -> (i32, i32) {
    %c0_i32 = arith.constant 0 : i32
    %c0_i32_0 = arith.constant 0 : i32
    %c0_i32_1 = arith.constant 0 : i32
    return %c0_i32, %c0_i32_0 : i32, i32
  }
  func.func @transform_7(%arg0: i32) -> (i32, i32, i32) {
    %c0_i32 = arith.constant 0 : i32
    %c0_i32_0 = arith.constant 0 : i32
    %c0_i32_1 = arith.constant 0 : i32
    return %arg0, %c0_i32, %c0_i32_0 : i32, i32, i32
  }
}

</mosaic_0001>

<bundles_post_ra>
// kernel: mean_and_token_graph_forward.1
= control target key start
LH: loop header
LB: loop body
LE: loop exit
PB: predicated region body
PF: predicated region fallthrough
CT: control target
= control target key end

     0   :  { %12 = vsyncpa [#allocation3], 0  ;;  %s1642_s0 = inlined_call_operand.vmem [shape: f32[2,1,8,32], index: 0, kind: input, shape index: {}]   ;;  %s1643_s1 = inlined_call_operand.vmem [shape: f32[4,32,32], index: 1, kind: input, shape index: {}]   ;;  %s1644_s2 = inlined_call_operand.vmem [shape: f32[6,32], index: 2, kind: input, shape index: {}]   ;;  %s1645_s3 = inlined_call_operand.vmem [shape: f32[32,16], index: 3, kind: input, shape index: {}]   ;;  %s1646_s4 = inlined_call_operand.vmem [shape: f32[1,16], index: 4, kind: input, shape index: {}]   ;;  %s1647_s5 = inlined_call_operand.vmem [shape: f32[16,128], index: 5, kind: input, shape index: {}]   ;;  %s1648_s6 = inlined_call_operand.vmem [shape: f32[1,128], index: 6, kind: input, shape index: {}]   ;;  %s1649_s7 = inlined_call_operand.hbm [shape: f32[2,1,128], index: 7, kind: output, shape index: {}]  }
   0x1   :  { %14 = vsyncpa [#allocation3 + $0x1], 0  ;;  %s1401_s24 = smov 0   ;;  %s1403_s25 = smov 0  }
   0x2   :  { %s1405_s26 = smov 0   ;;  %s1407_s27 = smov 0  }
   0x3 LB: > { %s1422_s28 = sadd.s32 4294967295, %s1356_s27   ;;  %s1102_s29 = sadd.s32 4294967294, %s1356_s27   ;;  %s1356_s27 = sphi %s1407_s27, %s1655_s27   ;;  %s1352_s26 = sphi %s1405_s26, %s1654_s26   ;;  %s1348_s25 = sphi %s1403_s25, %s1653_s25   ;;  %s1344_s24 = sphi %s1401_s24, %s1652_s24  }
   0x4   : > { %s1426_s30 = sadd.s32 1, %s1356_s27   ;;  %s179_s8 = sadd.s32 1, %s1352_s26 }
   0x5   : > { %s176_s9 = ssub.s32 %s1356_s27, %s1426_s30  ;;  %p189_p0 = scmp.ne.s32.totalorder %s1352_s26, %s1348_s25 }
   0x6   : > { %p177_p1 = scmp.eq.s32.totalorder %s176_s9, 0  ;;  %p190_p2 = scmp.eq.s32.totalorder %s1422_s28, 1 }
   0x7   : > { %p195_p3 = scmp.ne.s32.totalorder %s1348_s25, %s1344_s24  ;;  %p196_p4 = scmp.eq.s32.totalorder %s1102_s29, 1 }
   0x8   : > { %s1437_s10 = scalar_select %p177_p1, %s1352_s26, %s179_s8  }
   0x9   : > { %p1439_p5 = por %p190_p2, %p189_p0  ;;  %p1443_p6 = por %p196_p4, %p195_p3 }
   0xa   : > { %p1105_p7 = scmp.ge.s32.totalorder %s1356_s27, 1  ;;  %p239_p8 = scmp.lt.s32.totalorder %s1356_s27, 3 }
   0xc   : > { %p240_p9 = pnand %p1105_p7, %p239_p8 }
   0xd   : > { %p269_p10 = scmp.lt.s32.totalorder (!%p240_p9), %s1422_s28, 1  ;;  %s267_s20 = sand.u32 (!%p240_p9), 1, %s1348_s25  }
   0xe   : > { %243 = sbr.rel (%p240_p9) target bundleno = 2199 (0x897), region = 48  ;;  %s1135_s23 = sshll.u32 (!%p240_p9), %s1422_s28, 4 }
   0xf   : > { %s268_s29 = scalar_lea.vmem (!%p240_p9), [#allocation2], %s267_s20  ;;  %s1607_s14 = scalar_lea.hbm (!%p240_p9), %s1649_s7, %s1135_s23 }
  0x10   : > { %s1047_s8 = sshll.u32 (!%p240_p9), %s268_s29, 4  ;;  %s1035_s15 = scalar_lea.sflag (!%p240_p9), [#allocation3], %s267_s20  ;;  %s1048_s8 = int_to_ptr.vmem [resolvable:$true] %s1047_s8 }
  0x11   : > { %s1296_s16 = scalar_lea.vmem (!%p240_p9), %s1048_s8, 16 }
  0x12   : > { %p1297_p11 = scmp.ne.s32.totalorder (!%p240_p9), %s1048_s8, %s1296_s16 }
  0x13   : > { %v1112_v0 = vld [vmem:[%s1643_s1 + $0x38] sm:$0xff]  ;;  %v1358_v2 = vmov 0.0   ;;  %v1111_v3 = vld [vmem:[%s1643_s1 + $0x30] sm:$0xff]  ;;  %s270_s21 = scalar_select %p269_p10, %s1422_s28, 1  ;;  %v1110_v5 = vld [vmem:[%s1643_s1 + $0x28] sm:$0xff]  ;;  %vm283_vm0 = vcmask 261120  }
  0x14   : > { %v277_v1 = vld [vmem:[%s1643_s1 + $0x18] sm:$0xff]  ;;  %1183 = vmatprep.subr.mxu1 %v1358_v2  ;;  %1172 = vmatprep.subr.mxu0 %v1358_v2  ;;  %v276_v4 = vld [vmem:[%s1643_s1 + $0x10] sm:$0xff]  ;;  %v275_v6 = vld [vmem:[%s1643_s1 + $0x8] sm:$0xff]  ;;  %vm1359_vm1 = vmmov 0   ;;  %vm514_vm2 = vcmask 64512   ;;  %vm959_vm3 = vcmask 130048   ;;  %p1298_p12 = pnand %p1297_p11, %p1439_p5 }
  0x15   : > { %1184 = vmatpush3.msra.mxu1 %v1112_v0  ;;  %1173 = vmatpush3.msra.mxu0 %v277_v1  ;;  %s1106_s9 = sshll.u32 %s270_s21, 3  ;;  %v1109_v7 = vld [vmem:[%s1643_s1 + $0x20] sm:$0xff]  ;;  %v1120_v10 = vld [vmem:[%s1643_s1 + $0x58] sm:$0xff]  ;;  %v1119_v11 = vld [vmem:[%s1643_s1 + $0x50] sm:$0xff] }
  0x16   : > { %1185 = vmatprep.subr.mxu1 %v1358_v2  ;;  %1174 = vmatprep.subr.mxu0 %v1358_v2  ;;  %s272_s17 = scalar_lea.vmem %s1642_s0, %s1106_s9  ;;  %v274_v8 = vld [vmem:[%s1643_s1] sm:$0xff]  ;;  %v1118_v12 = vld [vmem:[%s1643_s1 + $0x48] sm:$0xff]  ;;  %v1128_v40 = vld [vmem:[%s1643_s1 + $0x78] sm:$0xff]  ;;  %p1299_p13 = pneg %p1298_p12 }
  0x17   : > { %1186 = vmatpush3.msra.mxu1 %v1111_v3  ;;  %1175 = vmatpush3.msra.mxu0 %v276_v4  ;;  %v273_v9 = vld [vmem:[%s272_s17] sm:$0xff]  ;;  %v1127_v41 = vld [vmem:[%s1643_s1 + $0x70] sm:$0xff]  ;;  %v1126_v42 = vld [vmem:[%s1643_s1 + $0x68] sm:$0xff]  ;;  %s1360_s17 = smov [#allocation2]  }
  0x18   : > { %1187 = vmatprep.subr.mxu1 %v1358_v2  ;;  %1176 = vmatprep.subr.mxu0 %v1358_v2  ;;  %v1117_v13 = vld [vmem:[%s1643_s1 + $0x40] sm:$0xff]  ;;  %v880_v0 = vld [vmem:[%s1645_s3 + $0x18] sm:$0xff]  ;;  %v879_v1 = vld [vmem:[%s1645_s3 + $0x10] sm:$0xff]  ;;  %s1300_s28 = sshll.u32 %s1360_s17, 4  ;;  %s1301_s28 = int_to_ptr.vmem [resolvable:$false] %s1300_s28 }
  0x19   : > { %1188 = vmatpush3.msra.mxu1 %v1110_v5  ;;  %1177 = vmatpush3.msra.mxu0 %v275_v6  ;;  %v1113_v14 = vld [vmem:[%s1644_s2 + $0x1] ss:$0 sm:$0xff]  ;;  %v1107_v15 = vld [vmem:[%s1644_s2] ss:$0 sm:$0xff]  ;;  %v1123_v48 = vld [vmem:[%s1644_s2 + $0x2] ss:$0 sm:$0xff]  ;;  %p1303_p0 = scmp.lt.s32.totalorder %s1048_s8, %s1301_s28 }
  0x1a   : > { %1189 = vmatprep.subr.mxu1 %v1358_v2  ;;  %1178 = vmatprep.subr.mxu0 %v1358_v2  ;;  %v1125_v43 = vld [vmem:[%s1643_s1 + $0x60] sm:$0xff]  ;;  %v878_v3 = vld [vmem:[%s1645_s3 + $0x8] sm:$0xff]  ;;  %s1302_s18 = scalar_lea.vmem %s1301_s28, 32 }
  0x1b   : > { %1190 = vmatpush3.msra.mxu1 %v1109_v7  ;;  %1191 = vmatprep.mubr.msk.f32.mxu1 %vm1359_vm1, %v1358_v2  ;;  %v1124_v50 = vld [vmem:[%s1644_s2 + $0x3] ss:$0 sm:$0xff]  ;;  %p1304_p1 = scmp.lt.s32.totalorder %s1302_s18, %s1296_s16 }
  0x1c   : > { %1179 = vmatpush3.msra.mxu0 %v274_v8  ;;  %1180 = vmatprep.mubr.msk.f32.mxu0 %vm1359_vm1, %v1358_v2  ;;  %v877_v4 = vld [vmem:[%s1645_s3] sm:$0xff] }
  0x1d   : > { %1192 = vmatmul.mubr.msk.f32.vlgmr.msra.gmra.mxu1 %vm283_vm0, %v273_v9  ;;  %1181 = vmatmul.mubr.msk.f32.vlgmr.msra.gmra.mxu0 %vm283_vm0, %v273_v9  ;;  %p1305_p2 = por %p1304_p1, %p1303_p0 }
  0x1e   : > { %1194 = vmatprep.subr.mxu0 %v1358_v2  ;;  %1196 = vmatprep.mubr.msk.f32.mxu0 %vm1359_vm1, %v1358_v2 }
  0x1f   : > { %1199 = vmatprep.subr.mxu1 %v1358_v2  ;;  %1207 = vmatprep.mubr.msk.f32.mxu1 %vm1359_vm1, %v1358_v2  ;;  %p1306_p3 = pnand %p1305_p2, %p1299_p13 }
  0x20   : > { %1200 = vmatpush3.msra.mxu1 %v1120_v10 }
  0x21   : > { %1201 = vmatprep.subr.mxu1 %v1358_v2 }
  0x22   : > { %1202 = vmatpush3.msra.mxu1 %v1119_v11  ;;  %v1132_v11 = vld [vmem:[%s1644_s2 + $0x5] ss:$0 sm:$0xff] }
  0x23   : > { %1203 = vmatprep.subr.mxu1 %v1358_v2 }
  0x24   : > { %1204 = vmatpush3.msra.mxu1 %v1118_v12 }
  0x25   : > { %1205 = vmatprep.subr.mxu1 %v1358_v2 }
  0x26   : > { %1206 = vmatpush3.msra.mxu1 %v1117_v13 }
  0x27   : > { %1208 = vmatmul.mubr.msk.f32.vlgmr.msra.gmra.mxu1 %vm283_vm0, %v273_v9  ;;  %1226 = vmatprep.subr.mxu1 %v1358_v2  ;;  %v1131_v9 = vld [vmem:[%s1644_s2 + $0x4] ss:$0 sm:$0xff] }
  0x28   : > { %1228 = vmatprep.mubr.msk.f32.mxu1 %vm1359_vm1, %v1358_v2 }
  0xdd   : > { %v433_v16 = vpop.f32.mrf.mxu1  ;;  %v353_v17 = vpop.f32.mrf.mxu0 }
  0xde   : > { %v434_v18 = vadd.f32 %v1113_v14, %v433_v16  ;;  %v354_v19 = vadd.f32 %v1107_v15, %v353_v17 }
  0xdf   : > { %v1193_v20 = vpop.f32.mrf.mxu1  ;;  %v1182_v21 = vpop.f32.mrf.mxu0 }
  0xe0   : > { %1195 = vmatpush3.xpose.msk.msra.mxu0 %vm283_vm0, %v434_v18 }
  0xe1   : > { %1210 = vmatprep.subr.mxu0 %v1358_v2 }
  0xe3   : > { %1197 = vmatmul.mubr.msk.f32.vlgmr.msra.gmra.mxu0 %vm283_vm0, %v354_v19 }
  0xe4   : > { %1212 = vmatprep.mubr.msk.f32.mxu0 %vm1359_vm1, %v1358_v2 }
  0xe7   : > { %v592_v26 = vpop.f32.mrf.mxu1 }
  0xe8   : > { %1211 = vmatpush3.msra.mxu0 %v592_v26 }
  0xe9   : > { %v1209_v27 = vpop.f32.mrf.mxu1  ;;  %1215 = vmatprep.subr.mxu0 %v1358_v2 }
 0x1a3   : > { %v509_v22 = vpop.f32.mrf.mxu0 }
 0x1a4   : > { %v513_v23 = vmul.f32 %v509_v22, %v509_v22 }
 0x1a5   : > { %v1198_v24 = vpop.f32.mrf.mxu0 }
 0x1a6   : > { %v515_v25 = vsel %vm514_vm2, %v513_v23, 0.0  ;;  %v956_v24 = vld [vmem:[%s1647_s5] sm:$0xff] }
 0x1a7   : > { %516 = vadd.xlane.f32.xlu0 %v515_v25  ;;  %v881_v25 = vld [vmem:[%s1646_s4] sm:$0x1] }
 0x230   : > { %v517_v28 = vpop.xlane.xlu0 %516 }
 0x231   : > { %v518_v29 = vmax.f32 %v517_v28, 1e-12 }
 0x233   : > { %1290 = vrcp.f32 %v518_v29 }
 0x240   : > { %v1291_v30 = vpop.eup %1290 }
 0x241   : > { %v520_v31 = vmul.f32 %v1291_v30, %v513_v23  ;;  %v957_v23 = vld [vmem:[%s1647_s5 + $0x8] sm:$0xff] }
 0x243   : > { %1213 = vmatmul.mubr.msk.f32.vlgmr.msra.gmra.mxu0 %vm514_vm2, %v520_v31 }
 0x244   : > { %1223 = vmatprep.mubr.msk.f32.mxu0 %vm1359_vm1, %v1358_v2  ;;  %1216 = vmatpush3.msra.mxu0 %v1128_v40 }
 0x245   : > { %1217 = vmatprep.subr.mxu0 %v1358_v2 }
 0x246   : > { %1218 = vmatpush3.msra.mxu0 %v1127_v41 }
 0x247   : > { %1219 = vmatprep.subr.mxu0 %v1358_v2 }
 0x248   : > { %1220 = vmatpush3.msra.mxu0 %v1126_v42 }
 0x249   : > { %1221 = vmatprep.subr.mxu0 %v1358_v2 }
 0x24a   : > { %1222 = vmatpush3.msra.mxu0 %v1125_v43 }
 0x24b   : > { %1242 = vmatprep.subr.mxu0 %v1358_v2 }
 0x303   : > { %v665_v32 = vpop.f32.mrf.mxu0 }
 0x304   : > { %v669_v33 = vsel %vm283_vm0, %v665_v32, 0.0 }
 0x305   : > { %670 = vadd.xlane.f32.xlu0 %v669_v33  ;;  %v1214_v34 = vpop.f32.mrf.mxu0 }
 0x38e   : > { %v671_v35 = vpop.xlane.xlu0 %670 }
 0x38f   : > { %v672_v36 = vmul.f32 0.03125, %v671_v35 }
 0x391   : > { %v673_v37 = vsub.f32 %v665_v32, %v672_v36 }
 0x393   : > { %v674_v38 = vmul.f32 %v673_v37, %v673_v37 }
 0x395   : > { %v675_v39 = vsel %vm283_vm0, %v674_v38, 0.0 }
 0x396   : > { %676 = vadd.xlane.f32.xlu1 %v675_v39 }
 0x41f   : > { %v677_v44 = vpop.xlane.xlu1 %676 }
 0x420   : > { %v678_v45 = vmul.f32 0.03125, %v677_v44 }
 0x422   : > { %v679_v46 = vadd.f32 1e-05, %v678_v45 }
 0x424   : > { %1292 = vrsqrt.f32 %v679_v46 }
 0x431   : > { %v1293_v47 = vpop.eup %1292 }
 0x432   : > { %v681_v49 = vmul.f32 %v1293_v47, %v673_v37 }
 0x434   : > { %v687_v51 = vmul.f32 %v1123_v48, %v681_v49 }
 0x436   : > { %v693_v52 = vadd.f32 %v1124_v50, %v687_v51 }
 0x438   : > { %v694_v53 = vmax.f32 %v693_v52, 0.0 }
 0x43a   : > { %1224 = vmatmul.mubr.msk.f32.vlgmr.msra.gmra.mxu0 %vm283_vm0, %v694_v53 }
 0x43b   : > { %1246 = vmatprep.mubr.msk.f32.mxu0 %vm1359_vm1, %v1358_v2  ;;  %1243 = vmatpush3.msra.mxu0 %v957_v23 }
 0x43c   : > { %1244 = vmatprep.subr.mxu0 %v1358_v2 }
 0x43d   : > { %1245 = vmatpush3.msra.mxu0 %v956_v24 }
 0x4fa   : > { %v769_v54 = vpop.f32.mrf.mxu0 }
 0x4fb   : > { %1227 = vmatpush3.msra.mxu1 %v769_v54 }
 0x4fc   : > { %v1225_v55 = vpop.f32.mrf.mxu0  ;;  %1229 = vmatmul.mubr.msk.f32.vlgmr.msra.gmra.mxu1 %vm514_vm2, %v520_v31  ;;  %1231 = vmatprep.subr.mxu1 %v1358_v2 }
 0x4fd   : > { %1239 = vmatprep.mubr.msk.f32.mxu1 %vm1359_vm1, %v1358_v2  ;;  %1232 = vmatpush3.msra.mxu1 %v880_v0 }
 0x4fe   : > { %1233 = vmatprep.subr.mxu1 %v1358_v2 }
 0x4ff   : > { %1234 = vmatpush3.msra.mxu1 %v879_v1 }
 0x500   : > { %1235 = vmatprep.subr.mxu1 %v1358_v2 }
 0x501   : > { %1236 = vmatpush3.msra.mxu1 %v878_v3 }
 0x502   : > { %1237 = vmatprep.subr.mxu1 %v1358_v2  ;;  %v958_v2 = vld [vmem:[%s1648_s6] sm:$0x1] }
 0x503   : > { %1238 = vmatpush3.msra.mxu1 %v877_v4 }
 0x5bc   : > { %v839_v56 = vpop.f32.mrf.mxu1 }
 0x5bd   : > { %v843_v57 = vsel %vm283_vm0, %v839_v56, 0.0 }
 0x5be   : > { %844 = vadd.xlane.f32.xlu1 %v843_v57  ;;  %v1230_v58 = vpop.f32.mrf.mxu1 }
 0x647   : > { %v845_v59 = vpop.xlane.xlu1 %844 }
 0x648   : > { %v846_v60 = vmul.f32 0.03125, %v845_v59 }
 0x64a   : > { %v847_v61 = vsub.f32 %v839_v56, %v846_v60 }
 0x64c   : > { %v848_v62 = vmul.f32 %v847_v61, %v847_v61 }
 0x64e   : > { %v849_v63 = vsel %vm283_vm0, %v848_v62, 0.0 }
 0x64f   : > { %850 = vadd.xlane.f32.xlu0 %v849_v63 }
 0x6d8   : > { %v851_v5 = vpop.xlane.xlu0 %850 }
 0x6d9   : > { %v852_v6 = vmul.f32 0.03125, %v851_v5 }
 0x6db   : > { %v853_v7 = vadd.f32 1e-05, %v852_v6 }
 0x6dd   : > { %1294 = vrsqrt.f32 %v853_v7 }
 0x6ea   : > { %v1295_v8 = vpop.eup %1294 }
 0x6eb   : > { %v855_v10 = vmul.f32 %v1295_v8, %v847_v61 }
 0x6ed   : > { %v861_v12 = vmul.f32 %v1131_v9, %v855_v10 }
 0x6ef   : > { %v867_v13 = vadd.f32 %v1132_v11, %v861_v12 }
 0x6f1   : > { %v868_v14 = vmax.f32 %v867_v13, 0.0 }
 0x6f3   : > { %v869_v15 = vsel %vm283_vm0, %v868_v14, 0.0 }
 0x6f4   : > { %v870_v16 = vrot.slane %v869_v15, 4 }
 0x6f6   : > { %v871_v17 = vadd.f32 %v870_v16, %v869_v15 }
 0x6f8   : > { %v872_v18 = vrot.slane %v871_v17, 2 }
 0x6fa   : > { %v873_v19 = vadd.f32 %v872_v18, %v871_v17 }
 0x6fc   : > { %v874_v20 = vrot.slane %v873_v19, 1 }
 0x6fe   : > { %v875_v21 = vadd.f32 %v874_v20, %v873_v19 }
 0x700   : > { %v876_v22 = vmul.f32 0.125, %v875_v21 }
 0x702   : > { %1240 = vmatmul.mubr.msk.f32.vlgmr.msra.gmra.mxu1 %vm283_vm0, %v876_v22 }
 0x7c2   : > { %v951_v26 = vpop.f32.mrf.mxu1 }
 0x7c3   : > { %v952_v27 = vadd.f32 %v951_v26, %v881_v25 }
 0x7c4   : > { %v1241_v28 = vpop.f32.mrf.mxu1 }
 0x7c5   : > { %v955_v29 = vmax.f32 %v952_v27, 0.0 }
 0x7c7   : > { %1247 = vmatmul.mubr.msk.f32.vlgmr.msra.gmra.mxu0 %vm959_vm3, %v955_v29 }
 0x887   : > { %v1029_v30 = vpop.f32.mrf.mxu0 }
 0x888   : > { %v1030_v31 = vadd.f32 %v1029_v30, %v958_v2 }
 0x889   : > { %v1248_v32 = vpop.f32.mrf.mxu0 }
 0x88a   : > { %1033 = vst [vmem:[%s268_s29] sm:$0x1] %v1030_v31 }
 0x88b   : > { %1309 = shalt.err (!%p1306_p3)
}
 0x88c   : > { %s1310_s19 = scalar_lea.hbm %s1607_s14, 16  ;;  %s1314_s22 = scalar_lea.hbm %s1649_s7, 32 }
 0x88d   : > { %p1311_p4 = scmp.ne.s32.totalorder %s1607_s14, %s1310_s19  ;;  %p1315_p9 = scmp.lt.s32.totalorder %s1607_s14, %s1649_s7 }
 0x88e   : > { %p1316_p10 = scmp.lt.s32.totalorder %s1314_s22, %s1310_s19 }
 0x88f   : > { %p1312_p7 = pnand %p1311_p4, %p1439_p5 }
 0x890   : > { %p1317_p11 = por %p1316_p10, %p1315_p9 }
 0x891   : > { %p1313_p8 = pneg %p1312_p7 }
 0x893   : > { %p1318_p12 = pnand %p1317_p11, %p1313_p8 }
 0x895   : > { %1321 = shalt.err (!%p1318_p12)
}
 0x896   : > { %1249 = dma.vmem_to_hbm [thread:$0]  (%p1439_p5), %s1048_s8, 16, %s1607_s14, %s1035_s15  }
 0x897 PF: > { %p1255_p13 = scmp.ge.s32.totalorder %s1356_s27, 2  ;;  %s1059_s9 = sand.u32 1, %s1344_s24  }
 0x898   : > { %s1060_s13 = scalar_lea.sflag [#allocation3], %s1059_s9 }
 0x899   : > { %p1252_p0 = pnand %p1255_p13, %p1443_p6 }
 0x89b   : > { %p1253_p1 = pneg %p1252_p0 }
 0x89d   : > { %1339 = dma.done.wait (%p1253_p1), %s1060_s13, 16  }
 0x89e   : > { %1341 = vsyncadd (%p1253_p1), %s1060_s13, 4294967280  ;;  %p17_p2 = scmp.ge.s32.totalorder %s1426_s30, 4   ;;  %s1652_s24 = smov %s1348_s25 }
 0x89f   : > { %s1653_s25 = smov %s1352_s26  ;;  %s1654_s26 = smov %s1437_s10 }
 0x8a0   : > { %s1655_s27 = smov %s1426_s30  ;;  %19 = sbr.rel (!%p17_p2) target bundleno = 3 (0x3), region = 86 }
 0x8a5   :  { %1064 = vsyncpa [#allocation3], 1 }
 0x8a6   :  { %1066 = vsyncpa [#allocation3 + $0x1], 1 }

</bundles_post_ra>
